<compile_context>
chip_gen: v7x
topology: tpu7x:2x2x1
jax: 0.10.0
libtpu: 0.0.40
codegen_flags: <defaults>
</compile_context>

<pallas_src>
import jax
import jax.numpy as jnp
from jax.experimental import pallas as pl
from jax.experimental.pallas import tpu as pltpu

HIDDEN = 32            # hidden width of the SDF MLP
GROUPS = 8             # block-diagonal replication factor (fills 256-wide MXU)
MAX_TILE_LANES = 1024  # lanes (points per group) per grid step -> 8192 pts/step


def _round_up(x, m):
    return (x + m - 1) // m * m


def _sdf_mlp_kernel(x_ref, w1_ref, w2_ref, w3_ref, b12_ref, b3_ref, d_ref):
    """Fused block-diagonal SDF MLP on one lane-dense tile of packed points.

    x_ref  : (3*G, T)   bf16  points (G groups x xyz on sublanes, points on lanes)
    w1_ref : (G*H, 3*G) bf16  kron(I_G, W1)
    w2_ref : (G*H, G*H) bf16  kron(I_G, W2)
    w3_ref : (G,   G*H) bf16  kron(I_G, W3)
    b12_ref: (G*H, 2)   f32   column 0 = tiled b1, column 1 = tiled b2
    b3_ref : (1, 1)     f32   SMEM scalar
    d_ref  : (G, T)     f32   signed distances (sublane- and lane-dense)
    """
    x = x_ref[...]
    b1 = b12_ref[:, 0:1]
    b2 = b12_ref[:, 1:2]

    h = jnp.dot(w1_ref[...], x, preferred_element_type=jnp.float32) + b1
    h = jnp.maximum(h, 0.0).astype(jnp.bfloat16)

    h = jnp.dot(w2_ref[...], h, preferred_element_type=jnp.float32) + b2
    h = jnp.maximum(h, 0.0).astype(jnp.bfloat16)

    d = jnp.dot(w3_ref[...], h, preferred_element_type=jnp.float32) + b3_ref[0, 0]
    d_ref[...] = d.astype(d_ref.dtype)


def init_params(key):
    """Deterministic parameter init in the (out, in) layout, H = HIDDEN."""
    k1, k2, k3 = jax.random.split(key, 3)
    w1 = jax.random.normal(k1, (HIDDEN, 3), jnp.float32) * 0.5
    b1 = jnp.zeros((HIDDEN, 1), jnp.float32)
    w2 = jax.random.normal(k2, (HIDDEN, HIDDEN), jnp.float32) * (1.0 / HIDDEN ** 0.5)
    b2 = jnp.zeros((HIDDEN, 1), jnp.float32)
    w3 = jax.random.normal(k3, (1, HIDDEN), jnp.float32) * (1.0 / HIDDEN ** 0.5)
    b3 = jnp.zeros((1, 1), jnp.float32)
    return (w1, b1, w2, b2, w3, b3)


def pack_params(params):
    """One-time packing: block-diagonal bf16 weights + consolidated biases."""
    w1, b1, w2, b2, w3, b3 = params
    eye = jnp.eye(GROUPS, dtype=jnp.float32)
    w1p = jnp.kron(eye, w1).astype(jnp.bfloat16)          # (G*H, 3*G)
    w2p = jnp.kron(eye, w2).astype(jnp.bfloat16)          # (G*H, G*H)
    w3p = jnp.kron(eye, w3).astype(jnp.bfloat16)          # (G,   G*H)
    b12 = jnp.concatenate([jnp.tile(b1, (GROUPS, 1)),
                           jnp.tile(b2, (GROUPS, 1))], axis=1).astype(jnp.float32)
    b3s = jnp.asarray(b3, jnp.float32).reshape(1, 1)      # SMEM scalar
    return (w1p, w2p, w3p, b12, b3s)


@jax.jit
def neural_surface_forward(points, packed_params):
    """forward(points) == get_distance(points): (..., 3) -> (N, 1)."""
    w1p, w2p, w3p, b12, b3 = packed_params
    g, h = GROUPS, HIDDEN

    pts = points.reshape(-1, 3)
    n = pts.shape[0]

    # Pad N to a multiple of G*128 so every group gets a lane-aligned,
    # group-contiguous chunk of points (padding rows are discarded at the end).
    n_pad = _round_up(n, g * 128)
    n_group = n_pad // g
    pts_pad = jnp.pad(pts.astype(jnp.float32), ((0, n_pad - n), (0, 0)))

    # Packed lane-dense layout: row 3*grp + c holds coordinate c of group grp.
    # (pad + bf16 cast + transpose fuse into a single XLA copy.)
    x_packed = (pts_pad.reshape(g, n_group, 3)
                .transpose(0, 2, 1)
                .reshape(3 * g, n_group)
                .astype(jnp.bfloat16))

    # Tile choice: big tiles amortize per-step overhead; force >= 2 grid steps
    # when there is enough work so both v7x TensorCores get "parallel" steps.
    tile = min(MAX_TILE_LANES, n_group)
    if tile == n_group and n_group >= 256:
        tile = _round_up(n_group // 2, 128)
    grid = (pl.cdiv(n_group, tile),)

    const = lambda i: (0, 0)  # weights/biases: same full VMEM block every step

    flops = 2 * n_pad * (3 * h + h * h + h)
    bytes_accessed = (x_packed.size * 2 + n_pad * 4
                      + (w1p.size + w2p.size + w3p.size) * 2
                      + b12.size * 4 + 4)

    out = pl.pallas_call(
        _sdf_mlp_kernel,
        out_shape=jax.ShapeDtypeStruct((g, n_group), jnp.float32),
        grid_spec=pl.GridSpec(
            grid=grid,
            in_specs=[
                pl.BlockSpec((3 * g, tile), lambda i: (0, i)),      # points tile
                pl.BlockSpec((g * h, 3 * g), const),                # W1 packed
                pl.BlockSpec((g * h, g * h), const),                # W2 packed
                pl.BlockSpec((g, g * h), const),                    # W3 packed
                pl.BlockSpec((g * h, 2), const),                    # b1|b2 packed
                pl.BlockSpec(memory_space=pltpu.MemorySpace.SMEM),  # b3 scalar
            ],
            out_specs=pl.BlockSpec((g, tile), lambda i: (0, i)),
        ),
        compiler_params=pltpu.CompilerParams(
            dimension_semantics=("parallel",)),
        cost_estimate=pl.CostEstimate(
            flops=flops, transcendentals=0, bytes_accessed=bytes_accessed),
    )(x_packed, w1p, w2p, w3p, b12, b3)

    # (G, n_group) -> (N, 1): group grp, lane j  <->  padded point grp*n_group + j.
    return out.reshape(n_pad, 1)[:n]


def _reference_forward(points, params):
    """Pure-JAX reference with the same bf16-operand / f32-accumulate precision."""
    w1, b1, w2, b2, w3, b3 = params
    x = points.reshape(-1, 3).astype(jnp.bfloat16)
    h = jnp.dot(x, w1.T.astype(jnp.bfloat16),
                preferred_element_type=jnp.float32) + b1.T
    h = jnp.maximum(h, 0.0).astype(jnp.bfloat16)
    h = jnp.dot(h, w2.T.astype(jnp.bfloat16),
                preferred_element_type=jnp.float32) + b2.T
    h = jnp.maximum(h, 0.0).astype(jnp.bfloat16)
    return jnp.dot(h, w3.T.astype(jnp.bfloat16),
                   preferred_element_type=jnp.float32) + b3.T


if __name__ == "__main__":
    key = jax.random.PRNGKey(0)
    k_pts, k_pts2, k_par = jax.random.split(key, 3)
    params = init_params(k_par)
    packed = pack_params(params)

    # Small example: a batch of rays' sample points, (2, 128, 3) -> N = 256.
    points = jax.random.uniform(k_pts, (2, 128, 3), jnp.float32,
                                minval=-1.0, maxval=1.0)
    dist = jax.block_until_ready(neural_surface_forward(points, packed))
    ref = _reference_forward(points, params)
    assert dist.shape == (256, 1), dist.shape
    assert jnp.allclose(dist, ref, atol=2e-2, rtol=2e-2), "mismatch vs reference"

    # Second check: N = 4096 exercises the multi-tile (grid > 1) path.
    points2 = jax.random.uniform(k_pts2, (4096, 3), jnp.float32,
                                 minval=-1.0, maxval=1.0)
    dist2 = jax.block_until_ready(neural_surface_forward(points2, packed))
    ref2 = _reference_forward(points2, params)
    assert dist2.shape == (4096, 1), dist2.shape
    assert jnp.allclose(dist2, ref2, atol=2e-2, rtol=2e-2), "mismatch vs reference (big)"

    print("KERNEL_OK")
</pallas_src>

<mosaic_0001>
module attributes {stable_mosaic.version = 11 : i64} {
  func.func @_sdf_mlp_kernel(%arg0: i32, %arg1: memref<24x128xbf16, #tpu.memory_space<vmem>>, %arg2: memref<256x24xbf16, #tpu.memory_space<vmem>>, %arg3: memref<256x256xbf16, #tpu.memory_space<vmem>>, %arg4: memref<8x256xbf16, #tpu.memory_space<vmem>>, %arg5: memref<256x2xf32, #tpu.memory_space<vmem>>, %arg6: memref<1x1xf32, #tpu.memory_space<smem>>, %arg7: memref<8x128xf32, #tpu.memory_space<vmem>>) attributes {dimension_semantics = [#tpu.dimension_semantics<parallel>], iteration_bounds = array<i64: 1>, scalar_prefetch = 0 : i64, scratch_operands = 0 : i64, tpu.core_type = #tpu.core_type<tc>, window_params = [{transform_indices = @transform_0, window_bounds = array<i64: 24, 128>}, {pipeline_mode = #tpu.pipeline_mode<synchronous>, transform_indices = @transform_1, window_bounds = array<i64: 256, 24>}, {pipeline_mode = #tpu.pipeline_mode<synchronous>, transform_indices = @transform_2, window_bounds = array<i64: 256, 256>}, {pipeline_mode = #tpu.pipeline_mode<synchronous>, transform_indices = @transform_3, window_bounds = array<i64: 8, 256>}, {pipeline_mode = #tpu.pipeline_mode<synchronous>, transform_indices = @transform_4, window_bounds = array<i64: 256, 2>}, {transform_indices = @transform_5, window_bounds = array<i64: 1, 1>}, {transform_indices = @transform_6, window_bounds = array<i64: 8, 128>}]} {
    %c0 = arith.constant 0 : index
    %c0_0 = arith.constant 0 : index
    %0 = vector.load %arg1[%c0, %c0_0] : memref<24x128xbf16, #tpu.memory_space<vmem>>, vector<24x128xbf16>
    %c0_1 = arith.constant 0 : index
    %c0_2 = arith.constant 0 : index
    %1 = vector.load %arg5[%c0_1, %c0_2] : memref<256x2xf32, #tpu.memory_space<vmem>>, vector<256x1xf32>
    %c0_3 = arith.constant 0 : index
    %c1 = arith.constant 1 : index
    %2 = vector.load %arg5[%c0_3, %c1] : memref<256x2xf32, #tpu.memory_space<vmem>>, vector<256x1xf32>
    %c0_4 = arith.constant 0 : index
    %c0_5 = arith.constant 0 : index
    %3 = vector.load %arg2[%c0_4, %c0_5] : memref<256x24xbf16, #tpu.memory_space<vmem>>, vector<256x24xbf16>
    %cst = arith.constant dense<0.000000e+00> : vector<256x128xf32>
    %4 = tpu.matmul %3, %0, %cst {dimension_numbers = #tpu.dot_dimension_numbers<[1], [0], [0], [1], [0, 0, 1, 1], [], []>} : vector<256x24xbf16>, vector<24x128xbf16>, vector<256x128xf32> -> vector<256x128xf32>
    %5 = vector.broadcast %1 : vector<256x1xf32> to vector<256x128xf32>
    %6 = arith.addf %4, %5 : vector<256x128xf32>
    %cst_6 = arith.constant 0.000000e+00 : f32
    %7 = vector.broadcast %cst_6 : f32 to vector<256x128xf32>
    %8 = arith.maximumf %6, %7 : vector<256x128xf32>
    %9 = arith.truncf %8 : vector<256x128xf32> to vector<256x128xbf16>
    %c0_7 = arith.constant 0 : index
    %c0_8 = arith.constant 0 : index
    %10 = vector.load %arg3[%c0_7, %c0_8] : memref<256x256xbf16, #tpu.memory_space<vmem>>, vector<256x256xbf16>
    %cst_9 = arith.constant dense<0.000000e+00> : vector<256x128xf32>
    %11 = tpu.matmul %10, %9, %cst_9 {dimension_numbers = #tpu.dot_dimension_numbers<[1], [0], [0], [1], [0, 0, 1, 1], [], []>} : vector<256x256xbf16>, vector<256x128xbf16>, vector<256x128xf32> -> vector<256x128xf32>
    %12 = vector.broadcast %2 : vector<256x1xf32> to vector<256x128xf32>
    %13 = arith.addf %11, %12 : vector<256x128xf32>
    %cst_10 = arith.constant 0.000000e+00 : f32
    %14 = vector.broadcast %cst_10 : f32 to vector<256x128xf32>
    %15 = arith.maximumf %13, %14 : vector<256x128xf32>
    %16 = arith.truncf %15 : vector<256x128xf32> to vector<256x128xbf16>
    %c0_11 = arith.constant 0 : index
    %c0_12 = arith.constant 0 : index
    %17 = vector.load %arg4[%c0_11, %c0_12] : memref<8x256xbf16, #tpu.memory_space<vmem>>, vector<8x256xbf16>
    %cst_13 = arith.constant dense<0.000000e+00> : vector<8x128xf32>
    %18 = tpu.matmul %17, %16, %cst_13 {dimension_numbers = #tpu.dot_dimension_numbers<[1], [0], [0], [1], [0, 0, 1, 1], [], []>} : vector<8x256xbf16>, vector<256x128xbf16>, vector<8x128xf32> -> vector<8x128xf32>
    %c0_14 = arith.constant 0 : index
    %c0_15 = arith.constant 0 : index
    %19 = memref.load %arg6[%c0_14, %c0_15] : memref<1x1xf32, #tpu.memory_space<smem>>
    %20 = vector.broadcast %19 : f32 to vector<8x128xf32>
    %21 = arith.addf %18, %20 : vector<8x128xf32>
    %c0_16 = arith.constant 0 : index
    %c0_17 = arith.constant 0 : index
    %22 = vector.load %arg7[%c0_16, %c0_17] : memref<8x128xf32, #tpu.memory_space<vmem>>, vector<8x128xf32>
    tpu.vector_store %arg7[%c0_16, %c0_17], %21 {strides = array<i32>} : memref<8x128xf32, #tpu.memory_space<vmem>>, vector<8x128xf32>,
    return
  }
  func.func @transform_0(%arg0: i32) -> (i32, i32) {
    %c0_i32 = arith.constant 0 : i32
    %c0_i32_0 = arith.constant 0 : i32
    return %c0_i32, %arg0 : i32, i32
  }
  func.func @transform_1(%arg0: i32) -> (i32, i32) {
    %c0_i32 = arith.constant 0 : i32
    %c0_i32_0 = arith.constant 0 : i32
    %c0_i32_1 = arith.constant 0 : i32
    return %c0_i32, %c0_i32_0 : i32, i32
  }
  func.func @transform_2(%arg0: i32) -> (i32, i32) {
    %c0_i32 = arith.constant 0 : i32
    %c0_i32_0 = arith.constant 0 : i32
    %c0_i32_1 = arith.constant 0 : i32
    return %c0_i32, %c0_i32_0 : i32, i32
  }
  func.func @transform_3(%arg0: i32) -> (i32, i32) {
    %c0_i32 = arith.constant 0 : i32
    %c0_i32_0 = arith.constant 0 : i32
    %c0_i32_1 = arith.constant 0 : i32
    return %c0_i32, %c0_i32_0 : i32, i32
  }
  func.func @transform_4(%arg0: i32) -> (i32, i32) {
    %c0_i32 = arith.constant 0 : i32
    %c0_i32_0 = arith.constant 0 : i32
    %c0_i32_1 = arith.constant 0 : i32
    return %c0_i32, %c0_i32_0 : i32, i32
  }
  func.func @transform_5(%arg0: i32) -> (i32, i32) {
    %c0_i32 = arith.constant 0 : i32
    %c0_i32_0 = arith.constant 0 : i32
    %c0_i32_1 = arith.constant 0 : i32
    return %c0_i32, %c0_i32_0 : i32, i32
  }
  func.func @transform_6(%arg0: i32) -> (i32, i32) {
    %c0_i32 = arith.constant 0 : i32
    %c0_i32_0 = arith.constant 0 : i32
    return %c0_i32, %arg0 : i32, i32
  }
}

</mosaic_0001>

<bundles_post_ra>
// kernel: neural_surface_forward.1
= control target key start
LH: loop header
LB: loop body
LE: loop exit
PB: predicated region body
PF: predicated region fallthrough
CT: control target
= control target key end

     0   :  { %v1534_v0 = vmov 0   ;;  %vm341_vm0 = vcmask 195584   ;;  %vm390_vm1 = vcmask 1043456   ;;  %s2143_s0 = inlined_call_operand.vmem [shape: bf16[24,128], index: 0, kind: input, shape index: {}]   ;;  %s2144_s1 = inlined_call_operand.vmem [shape: bf16[256,24], index: 1, kind: input, shape index: {}]   ;;  %s2145_s4 = inlined_call_operand.vmem [shape: f32[256,2], index: 4, kind: input, shape index: {}]   ;;  %s2146_s2 = inlined_call_operand.vmem [shape: bf16[256,256], index: 2, kind: input, shape index: {}]   ;;  %s2147_s3 = inlined_call_operand.vmem [shape: bf16[8,256], index: 3, kind: input, shape index: {}]   ;;  %s2148_s5 = inlined_call_operand.<no memory space> [shape: f32[1,1], index: 5, kind: input, shape index: {}]   ;;  %s2149_s6 = inlined_call_operand.vmem [shape: f32[8,128], index: 6, kind: output, shape index: {}]  }
   0x1   :  { %1463 = vset.pattern.permute.xlu1 %v1534_v0  ;;  %1462 = vset.pattern.permute.xlu0 %v1534_v0  ;;  %v1466_v1 = vld [vmem:[%s2143_s0] sm:$0xff]   ;;  %v1467_v2 = vld [vmem:[%s2143_s0 + $0x8] ss:$0 sps:$4 sm:$0xff]   ;;  %v1470_v6 = vld [vmem:[%s2144_s1 + $0x10] sm:$0xff]  }
   0x2   :  { %v1468_v3 = vld [vmem:[%s2144_s1] sm:$0xff]   ;;  %1407 = vmatprep.subr.bf16.mxu0 %v1466_v1  ;;  %v392_v4 = vsel %vm390_vm1, %v1467_v2, 0  ;;  %v1469_v5 = vld [vmem:[%s2144_s1 + $0x8] sm:$0xff]   ;;  %v1471_v11 = vld [vmem:[%s2144_s1 + $0x18] sm:$0xff]  }
   0x3   :  { %1408 = vmatpush3.bf16.msra.mxu0 %v1466_v1  ;;  %1411 = vmatprep.mubr.msk.bf16.mxu0 %vm341_vm0, %v1468_v3  ;;  %v1590_v7 = vld [vmem:[%s2145_s4 + $0x80] sm:$0xff]  ;;  %v1603_v9 = vld [vmem:[%s2145_s4 + $0x88] sm:$0xff]  ;;  %v1619_v12 = vld [vmem:[%s2145_s4 + $0x90] sm:$0xff] }
   0x4   :  { %1459 = vmatprep.subr.msk.bf16.mxu0 %vm390_vm1, %v1467_v2  ;;  %174 = vperm.xlu0 %1462, %v1590_v7   ;;  %v1596_v8 = vld [vmem:[%s2145_s4] sm:$0xff]  ;;  %v1609_v10 = vld [vmem:[%s2145_s4 + $0x8] sm:$0xff]  ;;  %v1627_v14 = vld [vmem:[%s2145_s4 + $0x98] sm:$0xff] }
   0x5   :  { %94 = vperm.xlu1 %1463, %v1596_v8   ;;  %v1472_v13 = vld [vmem:[%s2144_s1 + $0x20] sm:$0xff]   ;;  %v1635_v15 = vld [vmem:[%s2145_s4 + $0x10] sm:$0xff]  ;;  %v1641_v16 = vld [vmem:[%s2145_s4 + $0x18] sm:$0xff] }
   0x6   :  { %v1473_v17 = vld [vmem:[%s2144_s1 + $0x28] sm:$0xff]   ;;  %v1651_v18 = vld [vmem:[%s2145_s4 + $0xa0] sm:$0xff]  ;;  %v1474_v19 = vld [vmem:[%s2144_s1 + $0x30] sm:$0xff]  }
   0x7   :  { %1410 = vmatpush3.bf16.msra.mxu0 %v392_v4  ;;  %v1659_v20 = vld [vmem:[%s2145_s4 + $0xa8] sm:$0xff]  ;;  %v1667_v21 = vld [vmem:[%s2145_s4 + $0x20] sm:$0xff]  ;;  %v1475_v23 = vld [vmem:[%s2144_s1 + $0x38] sm:$0xff]  }
   0x8   :  { %179 = vperm.xlu0 %1462, %v1603_v9   ;;  %v1673_v22 = vld [vmem:[%s2145_s4 + $0x28] sm:$0xff]  ;;  %v1683_v24 = vld [vmem:[%s2145_s4 + $0xb0] sm:$0xff]  ;;  %v1476_v25 = vld [vmem:[%s2144_s1 + $0x40] sm:$0xff]  }
   0x9   :  { %99 = vperm.xlu1 %1463, %v1609_v10   ;;  %v1691_v26 = vld [vmem:[%s2145_s4 + $0xb8] sm:$0xff]  ;;  %v1699_v27 = vld [vmem:[%s2145_s4 + $0x30] sm:$0xff]  ;;  %v1477_v29 = vld [vmem:[%s2144_s1 + $0x48] sm:$0xff]  }
   0xa   :  { %1412 = vmatmul.mubr.msk.bf16.vlgmr.msra.gmra.mrb[0].mxu0 %vm341_vm0, %v1469_v5  ;;  %v1705_v28 = vld [vmem:[%s2145_s4 + $0x38] sm:$0xff]  ;;  %v1715_v30 = vld [vmem:[%s2145_s4 + $0xc0] sm:$0xff]  ;;  %v1478_v31 = vld [vmem:[%s2144_s1 + $0x50] sm:$0xff]  }
   0xb   :  { %1415 = vmatprep.mubr.msk.bf16.mxu0 %vm341_vm0, %v1470_v6  ;;  %v1723_v32 = vld [vmem:[%s2145_s4 + $0xc8] sm:$0xff]  ;;  %v1731_v33 = vld [vmem:[%s2145_s4 + $0x40] sm:$0xff]  ;;  %v1479_v35 = vld [vmem:[%s2144_s1 + $0x58] sm:$0xff]  }
   0xc   :  { %184 = vperm.xlu0 %1462, %v1619_v12   ;;  %v1737_v34 = vld [vmem:[%s2145_s4 + $0x48] sm:$0xff]  ;;  %v1747_v36 = vld [vmem:[%s2145_s4 + $0xd0] sm:$0xff]  ;;  %v1480_v37 = vld [vmem:[%s2144_s1 + $0x60] sm:$0xff]  }
   0xd   :  { %189 = vperm.xlu1 %1463, %v1627_v14   ;;  %v1755_v38 = vld [vmem:[%s2145_s4 + $0xd8] sm:$0xff]  ;;  %v1763_v39 = vld [vmem:[%s2145_s4 + $0x50] sm:$0xff]  ;;  %v1481_v41 = vld [vmem:[%s2144_s1 + $0x68] sm:$0xff]  }
   0xe   :  { %v1769_v40 = vld [vmem:[%s2145_s4 + $0x58] sm:$0xff]  ;;  %v1779_v42 = vld [vmem:[%s2145_s4 + $0xe0] sm:$0xff]  ;;  %v1482_v43 = vld [vmem:[%s2144_s1 + $0x70] sm:$0xff]  }
   0xf   :  { %v1787_v44 = vld [vmem:[%s2145_s4 + $0xe8] sm:$0xff]  ;;  %v1795_v45 = vld [vmem:[%s2145_s4 + $0x60] sm:$0xff]  ;;  %v1483_v47 = vld [vmem:[%s2144_s1 + $0x78] sm:$0xff]  }
  0x10   :  { %104 = vperm.xlu0 %1462, %v1635_v15   ;;  %v1801_v46 = vld [vmem:[%s2145_s4 + $0x68] sm:$0xff]  ;;  %v1811_v48 = vld [vmem:[%s2145_s4 + $0xf0] sm:$0xff]  ;;  %v1816_v49 = vld [vmem:[%s2145_s4 + $0xf8] sm:$0xff] }
  0x11   :  { %109 = vperm.xlu1 %1463, %v1641_v16   ;;  %v1824_v50 = vld [vmem:[%s2145_s4 + $0x70] sm:$0xff]  ;;  %v1829_v51 = vld [vmem:[%s2145_s4 + $0x78] sm:$0xff]  ;;  %v1486_v56 = vld [vmem:[%s2146_s2 + $0x4] ss:$8 sps:$4 sm:$0xff]  }
  0x12   :  { %1416 = vmatmul.mubr.msk.bf16.gmra.mrb[4].mxu0 %vm341_vm0, %v1471_v11  ;;  %v1489_v57 = vld [vmem:[%s2146_s2 + $0x54] ss:$8 sps:$4 sm:$0xff]  }
  0x13   :  { %1419 = vmatprep.mubr.msk.bf16.mxu0 %vm341_vm0, %v1472_v13  ;;  %995 = vmatprep.mubr.bf16.mxu1 %v1489_v57  ;;  %v1535_v13 = vmov 1  }
  0x14   :  { %194 = vperm.xlu0 %1462, %v1651_v18  }
  0x15   :  { %199 = vperm.xlu1 %1463, %v1659_v20  }
  0x18   :  { %114 = vperm.xlu0 %1462, %v1667_v21  }
  0x19   :  { %119 = vperm.xlu1 %1463, %v1673_v22  }
  0x1a   :  { %1420 = vmatmul.mubr.msk.bf16.gmra.mrb[8].mxu0 %vm341_vm0, %v1473_v17 }
  0x1b   :  { %1423 = vmatprep.mubr.msk.bf16.mxu0 %vm341_vm0, %v1474_v19 }
  0x1c   :  { %204 = vperm.xlu0 %1462, %v1683_v24  }
  0x1d   :  { %209 = vperm.xlu1 %1463, %v1691_v26  }
  0x20   :  { %124 = vperm.xlu0 %1462, %v1699_v27  }
  0x21   :  { %129 = vperm.xlu1 %1463, %v1705_v28  }
  0x22   :  { %1424 = vmatmul.mubr.msk.bf16.gmra.mrb[12].mxu0 %vm341_vm0, %v1475_v23 }
  0x23   :  { %1427 = vmatprep.mubr.msk.bf16.mxu0 %vm341_vm0, %v1476_v25 }
  0x24   :  { %214 = vperm.xlu0 %1462, %v1715_v30  }
  0x25   :  { %219 = vperm.xlu1 %1463, %v1723_v32  }
  0x28   :  { %134 = vperm.xlu0 %1462, %v1731_v33  }
  0x29   :  { %139 = vperm.xlu1 %1463, %v1737_v34  }
  0x2a   :  { %1428 = vmatmul.mubr.msk.bf16.gmra.mrb[16].mxu0 %vm341_vm0, %v1477_v29 }
  0x2b   :  { %1431 = vmatprep.mubr.msk.bf16.mxu0 %vm341_vm0, %v1478_v31 }
  0x2c   :  { %224 = vperm.xlu0 %1462, %v1747_v36  }
  0x2d   :  { %229 = vperm.xlu1 %1463, %v1755_v38  }
  0x30   :  { %144 = vperm.xlu0 %1462, %v1763_v39  }
  0x31   :  { %149 = vperm.xlu1 %1463, %v1769_v40  }
  0x32   :  { %1432 = vmatmul.mubr.msk.bf16.gmra.mrb[20].mxu0 %vm341_vm0, %v1479_v35 }
  0x33   :  { %1435 = vmatprep.mubr.msk.bf16.mxu0 %vm341_vm0, %v1480_v37 }
  0x34   :  { %234 = vperm.xlu0 %1462, %v1779_v42  }
  0x35   :  { %239 = vperm.xlu1 %1463, %v1787_v44  }
  0x38   :  { %154 = vperm.xlu0 %1462, %v1795_v45  }
  0x39   :  { %159 = vperm.xlu1 %1463, %v1801_v46  }
  0x3a   :  { %1436 = vmatmul.mubr.msk.bf16.gmra.mrb[24].mxu0 %vm341_vm0, %v1481_v41 }
  0x3b   :  { %1439 = vmatprep.mubr.msk.bf16.mxu0 %vm341_vm0, %v1482_v43 }
  0x3c   :  { %244 = vperm.xlu0 %1462, %v1811_v48  }
  0x3d   :  { %249 = vperm.xlu1 %1463, %v1816_v49  }
  0x40   :  { %164 = vperm.xlu0 %1462, %v1824_v50  }
  0x41   :  { %169 = vperm.xlu1 %1463, %v1829_v51  }
  0x42   :  { %1440 = vmatmul.mubr.msk.bf16.gmra.mrb[28].mxu0 %vm341_vm0, %v1483_v47 }
  0x43   :  { %955 = vmatprep.mubr.bf16.mxu0 %v1486_v56 }
  0x44   :  { %1464 = vset.pattern.permute.xlu0 %v1535_v13 }
  0x45   :  { %1465 = vset.pattern.permute.xlu1 %v1535_v13  ;;  %700 = vperm.xlu0 %1464, %v1590_v7  }
  0x46   :  { %704 = vperm.xlu1 %1465, %v1603_v9  }
  0x49   :  { %640 = vperm.xlu0 %1464, %v1609_v10  }
  0x4a   :  { %636 = vperm.xlu1 %1465, %v1596_v8  }
  0x4d   :  { %712 = vperm.xlu0 %1464, %v1627_v14  }
  0x4e   :  { %708 = vperm.xlu1 %1465, %v1619_v12  }
  0x51   :  { %648 = vperm.xlu0 %1464, %v1641_v16  }
  0x52   :  { %644 = vperm.xlu1 %1465, %v1635_v15  }
  0x55   :  { %720 = vperm.xlu0 %1464, %v1659_v20  }
  0x56   :  { %716 = vperm.xlu1 %1465, %v1651_v18  }
  0x59   :  { %656 = vperm.xlu0 %1464, %v1673_v22  }
  0x5a   :  { %652 = vperm.xlu1 %1465, %v1667_v21  }
  0x5d   :  { %728 = vperm.xlu0 %1464, %v1691_v26  }
  0x5e   :  { %724 = vperm.xlu1 %1465, %v1683_v24  }
  0x61   :  { %664 = vperm.xlu0 %1464, %v1705_v28  }
  0x62   :  { %660 = vperm.xlu1 %1465, %v1699_v27  }
  0x65   :  { %736 = vperm.xlu0 %1464, %v1723_v32  }
  0x66   :  { %732 = vperm.xlu1 %1465, %v1715_v30  }
  0x69   :  { %672 = vperm.xlu0 %1464, %v1737_v34  }
  0x6a   :  { %668 = vperm.xlu1 %1465, %v1731_v33  }
  0x6d   :  { %744 = vperm.xlu0 %1464, %v1755_v38  }
  0x6e   :  { %740 = vperm.xlu1 %1465, %v1747_v36  }
  0x71   :  { %680 = vperm.xlu0 %1464, %v1769_v40  }
  0x72   :  { %676 = vperm.xlu1 %1465, %v1763_v39  }
  0x75   :  { %752 = vperm.xlu0 %1464, %v1787_v44  }
  0x76   :  { %748 = vperm.xlu1 %1465, %v1779_v42  }
  0x79   :  { %688 = vperm.xlu0 %1464, %v1801_v46  }
  0x7a   :  { %684 = vperm.xlu1 %1465, %v1795_v45  }
  0x7d   :  { %760 = vperm.xlu0 %1464, %v1816_v49  }
  0x7e   :  { %756 = vperm.xlu1 %1465, %v1811_v48  }
  0x81   :  { %696 = vperm.xlu0 %1464, %v1829_v51  }
  0x82   :  { %692 = vperm.xlu1 %1465, %v1824_v50  }
  0x83   :  { %v1833_v52 = vpop.permute.xlu0 %174 }
  0x84   :  { %v95_v53 = vpop.permute.xlu1 %94 }
  0x87   :  { %v1835_v54 = vpop.permute.xlu0 %179 }
  0x88   :  { %v100_v55 = vpop.permute.xlu1 %99 }
  0x8b   :  { %v1843_v58 = vpop.permute.xlu0 %184 }
  0x8c   :  { %v1845_v59 = vpop.permute.xlu1 %189 }
  0x8f   :  { %v105_v60 = vpop.permute.xlu0 %104 }
  0x90   :  { %v110_v61 = vpop.permute.xlu1 %109 }
  0x93   :  { %v1847_v62 = vpop.permute.xlu0 %194 }
  0x94   :  { %v1849_v63 = vpop.permute.xlu1 %199 }
  0x97   :  { %v115_v0 = vpop.permute.xlu0 %114 }
  0x98   :  { %v120_v1 = vpop.permute.xlu1 %119 }
  0x9b   :  { %v1851_v2 = vpop.permute.xlu0 %204 }
  0x9c   :  { %v1853_v3 = vpop.permute.xlu1 %209 }
  0x9f   :  { %v125_v4 = vpop.permute.xlu0 %124 }
  0xa0   :  { %v130_v5 = vpop.permute.xlu1 %129 }
  0xa3   :  { %v1855_v6 = vpop.permute.xlu0 %214 }
  0xa4   :  { %v1857_v11 = vpop.permute.xlu1 %219 }
  0xa7   :  { %v135_v17 = vpop.permute.xlu0 %134 }
  0xa8   :  { %v140_v19 = vpop.permute.xlu1 %139 }
  0xab   :  { %v1863_v23 = vpop.permute.xlu0 %224 }
  0xac   :  { %v1865_v25 = vpop.permute.xlu1 %229 }
  0xaf   :  { %v145_v29 = vpop.permute.xlu0 %144 }
  0xb0   :  { %v150_v35 = vpop.permute.xlu1 %149 }
  0xb3   :  { %v1873_v47 = vpop.permute.xlu0 %234 }
  0xb4   :  { %v1877_v16 = vpop.permute.xlu1 %239 }
  0xdd   :  { %v1413_v31 = vpop.f32.mrb[0].mxu0 }
  0xde   :  { %v437_v7 = vadd.f32 %v1413_v31, %v105_v60  ;;  %v428_v9 = vpop.f32.mrb[1].mxu0 }
  0xdf   :  { %v429_v8 = vadd.f32 %v428_v9, %v95_v53  ;;  %v1414_v37 = vpop.f32.mrb[2].mxu0 }
  0xe0   :  { %v440_v10 = vadd.f32 %v1414_v37, %v110_v61  ;;  %v431_v41 = vpop.f32.mrb[3].mxu0  ;;  %v557_v12 = vmax.f32 %v437_v7, 0.0  ;;  %v155_v7 = vpop.permute.xlu0 %154 }
  0xe1   :  { %v432_v43 = vadd.f32 %v431_v41, %v100_v55  ;;  %v555_v56 = vmax.f32 %v429_v8, 0.0 }
  0xe2   :  { %v558_v14 = vmax.f32 %v440_v10, 0.0  ;;  %v160_v10 = vpop.permute.xlu1 %159 }
  0xe3   :  { %v556_v15 = vmax.f32 %v432_v43, 0.0 }
  0xe4   :  { %v1875_v57 = vpack.c.bf16 %v558_v14, %v557_v12 }
  0xe5   :  { %v1879_v60 = vpack.c.bf16 %v556_v15, %v555_v56  ;;  %v1417_v53 = vpop.f32.mrb[4].mxu0 }
  0xe6   :  { %v453_v18 = vadd.f32 %v1417_v53, %v125_v4  ;;  %v444_v55 = vpop.f32.mrb[5].mxu0  ;;  %v1893_v56 = vpop.permute.xlu1 %249 }
  0xe7   :  { %v445_v20 = vadd.f32 %v444_v55, %v115_v0  ;;  %v1418_v61 = vpop.f32.mrb[6].mxu0 }
  0xe8   :  { %v456_v13 = vadd.f32 %v1418_v61, %v130_v5  ;;  %v447_v31 = vpop.f32.mrb[7].mxu0  ;;  %v561_v8 = vmax.f32 %v453_v18, 0.0  ;;  %v1891_v5 = vpop.permute.xlu0 %244 }
  0xe9   :  { %v448_v9 = vadd.f32 %v447_v31, %v120_v1  ;;  %v559_v41 = vmax.f32 %v445_v20, 0.0 }
  0xea   :  { %v562_v37 = vmax.f32 %v456_v13, 0.0  ;;  %v170_v61 = vpop.permute.xlu1 %169 }
  0xeb   :  { %v560_v43 = vmax.f32 %v448_v9, 0.0 }
  0xec   :  { %v1885_v21 = vpack.c.bf16 %v562_v37, %v561_v8 }
  0xed   :  { %v1887_v22 = vpack.c.bf16 %v560_v43, %v559_v41  ;;  %v1421_v4 = vpop.f32.mrb[8].mxu0 }
  0xee   :  { %v469_v0 = vadd.f32 %v1421_v4, %v145_v29  ;;  %v460_v1 = vpop.f32.mrb[9].mxu0  ;;  %v165_v29 = vpop.permute.xlu0 %164 }
  0xef   :  { %v461_v24 = vadd.f32 %v460_v1, %v135_v17  ;;  %v1422_v26 = vpop.f32.mrb[10].mxu0 }
  0xf0   :  { %v472_v12 = vadd.f32 %v1422_v26, %v150_v35  ;;  %v463_v14 = vpop.f32.mrb[11].mxu0  ;;  %v565_v53 = vmax.f32 %v469_v0, 0.0 }
  0xf1   :  { %v464_v15 = vadd.f32 %v463_v14, %v140_v19  ;;  %v563_v27 = vmax.f32 %v461_v24, 0.0 }
  0xf2   :  { %v566_v18 = vmax.f32 %v472_v12, 0.0 }
  0xf3   :  { %v564_v55 = vmax.f32 %v464_v15, 0.0 }
  0xf4   :  { %v1897_v28 = vpack.c.bf16 %v566_v18, %v565_v53 }
  0xf5   :  { %v1899_v20 = vpack.c.bf16 %v564_v55, %v563_v27  ;;  %v1425_v17 = vpop.f32.mrb[12].mxu0 }
  0xf6   :  { %v485_v35 = vadd.f32 %v1425_v17, %v165_v29  ;;  %v476_v19 = vpop.f32.mrb[13].mxu0 }
  0xf7   :  { %v477_v30 = vadd.f32 %v476_v19, %v155_v7  ;;  %v1426_v13 = vpop.f32.mrb[14].mxu0 }
  0xf8   :  { %v488_v32 = vadd.f32 %v1426_v13, %v170_v61  ;;  %v479_v31 = vpop.f32.mrb[15].mxu0  ;;  %v569_v8 = vmax.f32 %v485_v35, 0.0 }
  0xf9   :  { %v480_v9 = vadd.f32 %v479_v31, %v160_v10  ;;  %v567_v41 = vmax.f32 %v477_v30, 0.0 }
  0xfa   :  { %v570_v37 = vmax.f32 %v488_v32, 0.0 }
  0xfb   :  { %v568_v43 = vmax.f32 %v480_v9, 0.0 }
  0xfc   :  { %v1905_v4 = vpack.c.bf16 %v570_v37, %v569_v8 }
  0xfd   :  { %v1907_v33 = vpack.c.bf16 %v568_v43, %v567_v41  ;;  %v1429_v34 = vpop.f32.mrb[16].mxu0  ;;  %v1494_v41 = vld [vmem:[%s2146_s2 + $0x10] ss:$8 sps:$4 sm:$0xff]   ;;  %v1495_v43 = vld [vmem:[%s2146_s2 + $0x60] ss:$8 sps:$4 sm:$0xff]  }
  0xfe   :  { %v501_v7 = vadd.f32 %v1429_v34, %v1843_v58  ;;  %v492_v10 = vpop.f32.mrb[17].mxu0  ;;  %v1500_v34 = vld [vmem:[%s2146_s2 + $0x20] ss:$8 sps:$4 sm:$0xff]  }
  0xff   :  { %v493_v36 = vadd.f32 %v492_v10, %v1833_v52  ;;  %v1430_v0 = vpop.f32.mrb[18].mxu0  ;;  %v1502_v10 = vld [vmem:[%s2146_s2 + $0x34] ss:$8 sps:$4 sm:$0xff]  }
 0x100   :  { %v504_v38 = vadd.f32 %v1430_v0, %v1845_v59  ;;  %v495_v1 = vpop.f32.mrb[19].mxu0  ;;  %v573_v26 = vmax.f32 %v501_v7, 0.0  ;;  %v1501_v7 = vld [vmem:[%s2146_s2 + $0x70] ss:$8 sps:$4 sm:$0xff]  }
 0x101   :  { %v496_v24 = vadd.f32 %v495_v1, %v1835_v54  ;;  %v571_v39 = vmax.f32 %v493_v36, 0.0  ;;  %v1504_v36 = vld [vmem:[%s2146_s2 + $0x84] ss:$8 sps:$4 sm:$0xff]   ;;  %v1506_v0 = vld [vmem:[%s2146_s2 + $0x30] ss:$8 sps:$4 sm:$0xff]  }
 0x102   :  { %v574_v12 = vmax.f32 %v504_v38, 0.0  ;;  %v1507_v38 = vld [vmem:[%s2146_s2 + $0x80] ss:$8 sps:$4 sm:$0xff]   ;;  %v1508_v1 = vld [vmem:[%s2146_s2 + $0x44] ss:$8 sps:$4 sm:$0xff]  }
 0x103   :  { %v572_v14 = vmax.f32 %v496_v24, 0.0  ;;  %v1510_v24 = vld [vmem:[%s2146_s2 + $0x94] ss:$8 sps:$4 sm:$0xff]  }
 0x104   :  { %v596_v40 = vpack.c.bf16 %v574_v12, %v573_v26  ;;  %v1512_v26 = vld [vmem:[%s2146_s2 + $0x40] ss:$8 sps:$4 sm:$0xff]   ;;  %v1513_v12 = vld [vmem:[%s2146_s2 + $0x90] ss:$8 sps:$4 sm:$0xff]  }
 0x105   :  { %v595_v15 = vpack.c.bf16 %v572_v14, %v571_v39  ;;  %v1433_v58 = vpop.f32.mrb[20].mxu0  ;;  %v1514_v39 = vld [vmem:[%s2146_s2 + $0xa4] ss:$8 sps:$4 sm:$0xff]   ;;  %v1516_v14 = vld [vmem:[%s2146_s2 + $0xa0] ss:$8 sps:$4 sm:$0xff]  }
 0x106   :  { %v517_v52 = vadd.f32 %v1433_v58, %v1851_v2  ;;  %v508_v59 = vpop.f32.mrb[21].mxu0  ;;  %v1520_v58 = vld [vmem:[%s2146_s2 + $0xc4] ss:$8 sps:$4 sm:$0xff]  }
 0x107   :  { %v509_v54 = vadd.f32 %v508_v59, %v1847_v62  ;;  %v1434_v53 = vpop.f32.mrb[22].mxu0  ;;  %1273 = vmatprep.subr.bf16.mxu0 %v595_v15  ;;  %1443 = vmatprep.subr.bf16.mxu1 %v595_v15  ;;  %v1519_v15 = vld [vmem:[%s2146_s2 + $0xb0] ss:$8 sps:$4 sm:$0xff]   ;;  %v1523_v59 = vld [vmem:[%s2146_s2 + $0xd4] ss:$8 sps:$4 sm:$0xff]  }
 0x108   :  { %v520_v42 = vadd.f32 %v1434_v53, %v1853_v3  ;;  %v511_v44 = vpop.f32.mrb[23].mxu0  ;;  %1274 = vmatpush3.bf16.msra.mxu0 %v1879_v60  ;;  %1451 = vmatpush3.bf16.msra.mxu1 %v1879_v60  ;;  %v577_v45 = vmax.f32 %v517_v52, 0.0  ;;  %v1522_v52 = vld [vmem:[%s2146_s2 + $0xc0] ss:$8 sps:$4 sm:$0xff]   ;;  %v1526_v53 = vld [vmem:[%s2146_s2 + $0xe4] ss:$8 sps:$4 sm:$0xff]  }
 0x109   :  { %v512_v18 = vadd.f32 %v511_v44, %v1849_v63  ;;  %1275 = vmatprep.subr.bf16.mxu0 %v596_v40  ;;  %1444 = vmatprep.subr.bf16.mxu1 %v596_v40  ;;  %v575_v62 = vmax.f32 %v509_v54, 0.0  ;;  %v1517_v40 = vld [vmem:[%s2146_s2 + $0xb4] ss:$8 sps:$4 sm:$0xff]   ;;  %v1525_v54 = vld [vmem:[%s2146_s2 + $0xd0] ss:$8 sps:$4 sm:$0xff]  }
 0x10a   :  { %v578_v46 = vmax.f32 %v520_v42, 0.0  ;;  %v1528_v42 = vld [vmem:[%s2146_s2 + $0xe0] ss:$8 sps:$4 sm:$0xff]   ;;  %v1529_v44 = vld [vmem:[%s2146_s2 + $0xf4] ss:$8 sps:$4 sm:$0xff]  }
 0x10b   :  { %v576_v2 = vmax.f32 %v512_v18, 0.0  ;;  %v1531_v18 = vld [vmem:[%s2146_s2 + $0xf0] ss:$8 sps:$4 sm:$0xff]  }
 0x10c   :  { %v598_v27 = vpack.c.bf16 %v578_v46, %v577_v45  ;;  %1276 = vmatpush3.bf16.msra.mxu0 %v1875_v57  ;;  %1452 = vmatpush3.bf16.msra.mxu1 %v1875_v57  ;;  %v2041_v45 = vpop.permute.xlu1 %704  ;;  %v2043_v46 = vpop.permute.xlu0 %700 }
 0x10d   :  { %v597_v3 = vpack.c.bf16 %v576_v2, %v575_v62  ;;  %v1437_v55 = vpop.f32.mrb[24].mxu0 }
 0x10e   :  { %v533_v60 = vadd.f32 %v1437_v55, %v1863_v23  ;;  %v524_v63 = vpop.f32.mrb[25].mxu0 }
 0x10f   :  { %v525_v48 = vadd.f32 %v524_v63, %v1855_v6  ;;  %v1438_v29 = vpop.f32.mrb[26].mxu0  ;;  %1277 = vmatprep.subr.bf16.mxu0 %v597_v3  ;;  %1445 = vmatprep.subr.bf16.mxu1 %v597_v3 }
 0x110   :  { %v536_v49 = vadd.f32 %v1438_v29, %v1865_v25  ;;  %v527_v17 = vpop.f32.mrb[27].mxu0  ;;  %1278 = vmatpush3.bf16.msra.mxu0 %v1887_v22  ;;  %1453 = vmatpush3.bf16.msra.mxu1 %v1887_v22  ;;  %v581_v23 = vmax.f32 %v533_v60, 0.0  ;;  %v637_v62 = vpop.permute.xlu1 %636 }
 0x111   :  { %v528_v57 = vadd.f32 %v527_v17, %v1857_v11  ;;  %1279 = vmatprep.subr.bf16.mxu0 %v598_v27  ;;  %1446 = vmatprep.subr.bf16.mxu1 %v598_v27  ;;  %v579_v35 = vmax.f32 %v525_v48, 0.0  ;;  %v641_v2 = vpop.permute.xlu0 %640 }
 0x112   :  { %v582_v50 = vmax.f32 %v536_v49, 0.0 }
 0x113   :  { %v580_v51 = vmax.f32 %v528_v57, 0.0 }
 0x114   :  { %v600_v19 = vpack.c.bf16 %v582_v50, %v581_v23  ;;  %1280 = vmatpush3.bf16.msra.mxu0 %v1885_v21  ;;  %1454 = vmatpush3.bf16.msra.mxu1 %v1885_v21  ;;  %v2045_v27 = vpop.permute.xlu1 %708 }
 0x115   :  { %v599_v6 = vpack.c.bf16 %v580_v51, %v579_v35  ;;  %v1441_v25 = vpop.f32.mrb[28].mxu0  ;;  %v2047_v3 = vpop.permute.xlu0 %712  ;;  %v2070_v35 = vld [vmem:[%s2147_s3] sm:$0xff] }
 0x116   :  { %v549_v61 = vadd.f32 %v1441_v25, %v1891_v5  ;;  %v540_v30 = vpop.f32.mrb[29].mxu0  ;;  %v1254_v51 = vcombine.high %v2070_v35, %v2070_v35 }
 0x117   :  { %v541_v22 = vadd.f32 %v540_v30, %v1873_v47  ;;  %v1442_v13 = vpop.f32.mrb[30].mxu0  ;;  %1281 = vmatprep.subr.bf16.mxu0 %v599_v6  ;;  %1447 = vmatprep.subr.bf16.mxu1 %v599_v6 }
 0x118   :  { %v552_v11 = vadd.f32 %v1442_v13, %v1893_v56  ;;  %v543_v32 = vpop.f32.mrb[31].mxu0  ;;  %1282 = vmatpush3.bf16.msra.mxu0 %v1899_v20  ;;  %1455 = vmatpush3.bf16.msra.mxu1 %v1899_v20  ;;  %v585_v21 = vmax.f32 %v549_v61, 0.0  ;;  %v1487_v56 = vld [vmem:[%s2146_s2 + $0x50] ss:$8 sps:$4 sm:$0xff]   ;;  %v1492_v20 = vld [vmem:[%s2146_s2 + $0x64] ss:$8 sps:$4 sm:$0xff]   ;;  %v645_v55 = vpop.permute.xlu1 %644 }
 0x119   :  { %v544_v31 = vadd.f32 %v543_v32, %v1877_v16  ;;  %1283 = vmatprep.subr.bf16.mxu0 %v600_v19  ;;  %1448 = vmatprep.subr.bf16.mxu1 %v600_v19  ;;  %v583_v5 = vmax.f32 %v541_v22, 0.0  ;;  %v1484_v16 = vld [vmem:[%s2146_s2] ss:$8 sps:$4 sm:$0xff]   ;;  %v2049_v60 = vpop.permute.xlu0 %648 }
 0x11a   :  { %v586_v9 = vmax.f32 %v552_v11, 0.0 }
 0x11b   :  { %v584_v8 = vmax.f32 %v544_v31, 0.0 }
 0x11c   :  { %v602_v37 = vpack.c.bf16 %v586_v9, %v585_v21  ;;  %1284 = vmatpush3.bf16.msra.mxu0 %v1897_v28  ;;  %1456 = vmatpush3.bf16.msra.mxu1 %v1897_v28  ;;  %v1490_v28 = vld [vmem:[%s2146_s2 + $0x14] ss:$8 sps:$4 sm:$0xff]   ;;  %v2051_v63 = vpop.permute.xlu1 %716 }
 0x11d   :  { %v601_v47 = vpack.c.bf16 %v584_v8, %v583_v5  ;;  %v2053_v48 = vpop.permute.xlu0 %720 }
 0x11f   :  { %1285 = vmatprep.subr.bf16.mxu0 %v601_v47  ;;  %1449 = vmatprep.subr.bf16.mxu1 %v601_v47 }
 0x120   :  { %1286 = vmatpush3.bf16.msra.mxu0 %v1907_v33  ;;  %1457 = vmatpush3.bf16.msra.mxu1 %v1907_v33  ;;  %v1498_v33 = vld [vmem:[%s2146_s2 + $0x74] ss:$8 sps:$4 sm:$0xff]   ;;  %v2055_v29 = vpop.permute.xlu1 %652 }
 0x121   :  { %1287 = vmatprep.subr.bf16.mxu0 %v602_v37  ;;  %1450 = vmatprep.subr.bf16.mxu1 %v602_v37  ;;  %v2057_v49 = vpop.permute.xlu0 %656 }
 0x124   :  { %1288 = vmatpush3.bf16.msra.mxu0 %v1905_v4  ;;  %1458 = vmatpush3.bf16.msra.mxu1 %v1905_v4  ;;  %v1496_v4 = vld [vmem:[%s2146_s2 + $0x24] ss:$8 sps:$4 sm:$0xff]   ;;  %v2059_v17 = vpop.permute.xlu1 %724 }
 0x125   :  { %v2061_v57 = vpop.permute.xlu0 %728 }
 0x127   :  { %956 = vmatmul.mubr.bf16.vlgmr.msra.gmra.mrb[32].mxu0 %v1484_v16  ;;  %996 = vmatmul.mubr.bf16.vlgmr.msra.gmra.mrb[0].mxu1 %v1487_v56 }
 0x128   :  { %963 = vmatprep.mubr.bf16.mxu0 %v1490_v28  ;;  %1003 = vmatprep.mubr.bf16.mxu1 %v1492_v20  ;;  %v2063_v23 = vpop.permute.xlu1 %660 }
 0x129   :  { %v2065_v50 = vpop.permute.xlu0 %664 }
 0x12c   :  { %v2074_v19 = vpop.permute.xlu1 %732 }
 0x12d   :  { %v2076_v6 = vpop.permute.xlu0 %736 }
 0x12f   :  { %964 = vmatmul.mubr.bf16.gmra.mrb[36].mxu0 %v1494_v41  ;;  %1004 = vmatmul.mubr.bf16.gmra.mrb[4].mxu1 %v1495_v43 }
 0x130   :  { %971 = vmatprep.mubr.bf16.mxu0 %v1496_v4  ;;  %1011 = vmatprep.mubr.bf16.mxu1 %v1498_v33  ;;  %v2078_v25 = vpop.permute.xlu1 %668 }
 0x131   :  { %v2080_v61 = vpop.permute.xlu0 %672 }
 0x134   :  { %v2082_v30 = vpop.permute.xlu1 %740 }
 0x135   :  { %v2084_v22 = vpop.permute.xlu0 %744 }
 0x137   :  { %972 = vmatmul.mubr.bf16.gmra.mrb[40].mxu0 %v1500_v34  ;;  %1012 = vmatmul.mubr.bf16.gmra.mrb[8].mxu1 %v1501_v7 }
 0x138   :  { %979 = vmatprep.mubr.bf16.mxu0 %v1502_v10  ;;  %1019 = vmatprep.mubr.bf16.mxu1 %v1504_v36  ;;  %v677_v13 = vpop.permute.xlu1 %676 }
 0x139   :  { %v681_v11 = vpop.permute.xlu0 %680 }
 0x13c   :  { %v2086_v32 = vpop.permute.xlu1 %748 }
 0x13d   :  { %v2088_v31 = vpop.permute.xlu0 %752 }
 0x13f   :  { %980 = vmatmul.mubr.bf16.gmra.mrb[44].mxu0 %v1506_v0  ;;  %1020 = vmatmul.mubr.bf16.gmra.mrb[12].mxu1 %v1507_v38 }
 0x140   :  { %987 = vmatprep.mubr.bf16.mxu0 %v1508_v1  ;;  %1027 = vmatprep.mubr.bf16.mxu1 %v1510_v24  ;;  %v685_v21 = vpop.permute.xlu1 %684 }
 0x141   :  { %v689_v9 = vpop.permute.xlu0 %688 }
 0x144   :  { %v2090_v38 = vpop.permute.xlu1 %756 }
 0x145   :  { %v2092_v1 = vpop.permute.xlu0 %760 }
 0x147   :  { %988 = vmatmul.mubr.bf16.gmra.mrb[48].mxu0 %v1512_v26  ;;  %1028 = vmatmul.mubr.bf16.gmra.mrb[16].mxu1 %v1513_v12 }
 0x148   :  { %1035 = vmatprep.mubr.bf16.mxu1 %v1514_v39  ;;  %1174 = vmatprep.mubr.bf16.mxu0 %v1254_v51 }
 0x14f   :  { %1036 = vmatmul.mubr.bf16.gmra.mrb[20].mxu1 %v1516_v14 }
 0x150   :  { %1043 = vmatprep.mubr.bf16.mxu1 %v1517_v40 }
 0x157   :  { %1044 = vmatmul.mubr.bf16.gmra.mrb[24].mxu1 %v1519_v15 }
 0x158   :  { %1051 = vmatprep.mubr.bf16.mxu1 %v1520_v58 }
 0x15f   :  { %1052 = vmatmul.mubr.bf16.gmra.mrb[28].mxu1 %v1522_v52 }
 0x160   :  { %1059 = vmatprep.mubr.bf16.mxu1 %v1523_v59 }
 0x167   :  { %1060 = vmatmul.mubr.bf16.gmra.mrb[32].mxu1 %v1525_v54 }
 0x168   :  { %1067 = vmatprep.mubr.bf16.mxu1 %v1526_v53 }
 0x16f   :  { %1068 = vmatmul.mubr.bf16.gmra.mrb[36].mxu1 %v1528_v42 }
 0x170   :  { %1075 = vmatprep.mubr.bf16.mxu1 %v1529_v44 }
 0x177   :  { %1076 = vmatmul.mubr.bf16.gmra.mrb[40].mxu1 %v1531_v18 }
 0x1fa   :  { %v1319_v5 = vpop.f32.mrb[0].mxu1  ;;  %v1289_v8 = vpop.f32.mrb[32].mxu0 }
 0x1fb   :  { %v1320_v37 = vpop.f32.mrb[1].mxu1  ;;  %v1290_v47 = vpop.f32.mrb[33].mxu0 }
 0x1fc   :  { %v1321_v16 = vadd.f32 %v1320_v37, %v1319_v5  ;;  %v1322_v56 = vpop.f32.mrb[2].mxu1  ;;  %v1291_v28 = vadd.f32 %v1290_v47, %v1289_v8  ;;  %v1292_v20 = vpop.f32.mrb[34].mxu0 }
 0x1fd   :  { %v1323_v41 = vpop.f32.mrb[3].mxu1  ;;  %v1293_v43 = vpop.f32.mrb[35].mxu0 }
 0x1fe   :  { %v998_v4 = vadd.f32 %v1321_v16, %v677_v13  ;;  %v1324_v33 = vadd.f32 %v1323_v41, %v1322_v56  ;;  %v958_v34 = vadd.f32 %v1291_v28, %v637_v62  ;;  %v1294_v7 = vadd.f32 %v1293_v43, %v1292_v20  ;;  %v693_v37 = vpop.permute.xlu1 %692  ;;  %v697_v47 = vpop.permute.xlu0 %696 }
 0x200   :  { %v1001_v10 = vadd.f32 %v1324_v33, %v681_v11  ;;  %v1084_v36 = vmax.f32 %v958_v34, 0.0  ;;  %v961_v0 = vadd.f32 %v1294_v7, %v641_v2  ;;  %v1094_v24 = vmax.f32 %v998_v4, 0.0 }
 0x202   :  { %v1095_v26 = vmax.f32 %v1001_v10, 0.0  ;;  %v1325_v12 = vpop.f32.mrb[4].mxu1  ;;  %v1085_v39 = vmax.f32 %v961_v0, 0.0  ;;  %v1295_v14 = vpop.f32.mrb[36].mxu0 }
 0x203   :  { %v1326_v40 = vpop.f32.mrb[5].mxu1  ;;  %v1296_v15 = vpop.f32.mrb[37].mxu0 }
 0x204   :  { %v2094_v58 = vpack.c.bf16 %v1095_v26, %v1094_v24  ;;  %v1327_v52 = vadd.f32 %v1326_v40, %v1325_v12  ;;  %v1328_v59 = vpop.f32.mrb[6].mxu1  ;;  %v2096_v54 = vpack.c.bf16 %v1085_v39, %v1084_v36  ;;  %v1297_v53 = vadd.f32 %v1296_v15, %v1295_v14  ;;  %v1298_v42 = vpop.f32.mrb[38].mxu0 }
 0x205   :  { %v1329_v44 = vpop.f32.mrb[7].mxu1  ;;  %v1299_v18 = vpop.f32.mrb[39].mxu0 }
 0x206   :  { %v1006_v62 = vadd.f32 %v1327_v52, %v685_v21  ;;  %v1330_v2 = vadd.f32 %v1329_v44, %v1328_v59  ;;  %v966_v51 = vadd.f32 %v1297_v53, %v645_v55  ;;  %v1300_v13 = vadd.f32 %v1299_v18, %v1298_v42 }
 0x208   :  { %v1009_v11 = vadd.f32 %v1330_v2, %v689_v9  ;;  %v1086_v5 = vmax.f32 %v966_v51, 0.0  ;;  %v969_v8 = vadd.f32 %v1300_v13, %v2049_v60  ;;  %v1096_v16 = vmax.f32 %v1006_v62, 0.0 }
 0x20a   :  { %v1097_v56 = vmax.f32 %v1009_v11, 0.0  ;;  %v1331_v28 = vpop.f32.mrb[8].mxu1  ;;  %v1087_v20 = vmax.f32 %v969_v8, 0.0  ;;  %v1301_v41 = vpop.f32.mrb[40].mxu0 }
 0x20b   :  { %v1332_v43 = vpop.f32.mrb[9].mxu1  ;;  %v1302_v4 = vpop.f32.mrb[41].mxu0 }
 0x20c   :  { %v2099_v33 = vpack.c.bf16 %v1097_v56, %v1096_v16  ;;  %v1333_v34 = vadd.f32 %v1332_v43, %v1331_v28  ;;  %v1334_v21 = vpop.f32.mrb[10].mxu1  ;;  %v2101_v7 = vpack.c.bf16 %v1087_v20, %v1086_v5  ;;  %v1303_v55 = vadd.f32 %v1302_v4, %v1301_v41  ;;  %v1304_v9 = vpop.f32.mrb[42].mxu0 }
 0x20d   :  { %v1335_v10 = vpop.f32.mrb[11].mxu1  ;;  %v1305_v36 = vpop.f32.mrb[43].mxu0 }
 0x20e   :  { %v1014_v60 = vadd.f32 %v1333_v34, %v693_v37  ;;  %v1336_v0 = vadd.f32 %v1335_v10, %v1334_v21  ;;  %v974_v24 = vadd.f32 %v1303_v55, %v2055_v29  ;;  %v1306_v26 = vadd.f32 %v1305_v36, %v1304_v9 }
 0x210   :  { %v1017_v12 = vadd.f32 %v1336_v0, %v697_v47  ;;  %v1088_v39 = vmax.f32 %v974_v24, 0.0  ;;  %v977_v14 = vadd.f32 %v1306_v26, %v2057_v49  ;;  %v1098_v40 = vmax.f32 %v1014_v60, 0.0 }
 0x212   :  { %v1099_v15 = vmax.f32 %v1017_v12, 0.0  ;;  %v1089_v52 = vmax.f32 %v977_v14, 0.0  ;;  %v1307_v59 = vpop.f32.mrb[44].mxu0  ;;  %v1337_v53 = vpop.f32.mrb[12].mxu1 }
 0x213   :  { %v1308_v42 = vpop.f32.mrb[45].mxu0  ;;  %v1338_v44 = vpop.f32.mrb[13].mxu1 }
 0x214   :  { %v2105_v18 = vpack.c.bf16 %v1099_v15, %v1098_v40  ;;  %v2107_v62 = vpack.c.bf16 %v1089_v52, %v1088_v39  ;;  %v1309_v2 = vadd.f32 %v1308_v42, %v1307_v59  ;;  %v1339_v51 = vadd.f32 %v1338_v44, %v1337_v53  ;;  %v1310_v13 = vpop.f32.mrb[46].mxu0  ;;  %v1340_v29 = vpop.f32.mrb[14].mxu1 }
 0x215   :  { %v1311_v11 = vpop.f32.mrb[47].mxu0  ;;  %v1341_v5 = vpop.f32.mrb[15].mxu1 }
 0x216   :  { %v982_v8 = vadd.f32 %v1309_v2, %v2063_v23  ;;  %v1022_v49 = vadd.f32 %v1339_v51, %v2043_v46  ;;  %v1312_v37 = vadd.f32 %v1311_v11, %v1310_v13  ;;  %v1342_v47 = vadd.f32 %v1341_v5, %v1340_v29 }
 0x218   :  { %v985_v16 = vadd.f32 %v1312_v37, %v2065_v50  ;;  %v1025_v56 = vadd.f32 %v1342_v47, %v2041_v45  ;;  %v1090_v28 = vmax.f32 %v982_v8, 0.0  ;;  %v1100_v20 = vmax.f32 %v1022_v49, 0.0 }
 0x21a   :  { %v1091_v41 = vmax.f32 %v985_v16, 0.0  ;;  %v1101_v43 = vmax.f32 %v1025_v56, 0.0  ;;  %v1313_v4 = vpop.f32.mrb[48].mxu0  ;;  %v1343_v34 = vpop.f32.mrb[16].mxu1 }
 0x21b   :  { %v1314_v21 = vpop.f32.mrb[49].mxu0  ;;  %v1344_v55 = vpop.f32.mrb[17].mxu1 }
 0x21c   :  { %v1119_v9 = vpack.c.bf16 %v1091_v41, %v1090_v28  ;;  %v1315_v10 = vadd.f32 %v1314_v21, %v1313_v4  ;;  %v1345_v36 = vadd.f32 %v1344_v55, %v1343_v34  ;;  %v1316_v23 = vpop.f32.mrb[50].mxu0  ;;  %v1346_v60 = vpop.f32.mrb[18].mxu1  ;;  %v1124_v46 = vpack.c.bf16 %v1101_v43, %v1100_v20 }
 0x21d   :  { %v1317_v0 = vpop.f32.mrb[51].mxu0  ;;  %v1347_v24 = vpop.f32.mrb[19].mxu1 }
 0x21e   :  { %v990_v50 = vadd.f32 %v1315_v10, %v2078_v25  ;;  %v1030_v45 = vadd.f32 %v1345_v36, %v2045_v27  ;;  %v1318_v26 = vadd.f32 %v1317_v0, %v1316_v23  ;;  %v1348_v12 = vadd.f32 %v1347_v24, %v1346_v60  ;;  %1385 = vmatprep.subr.bf16.mxu0 %v1124_v46 }
 0x21f   :  { %1386 = vmatpush3.bf16.msra.mxu0 %v2096_v54 }
 0x220   :  { %v993_v39 = vadd.f32 %v1318_v26, %v2080_v61  ;;  %v1033_v14 = vadd.f32 %v1348_v12, %v2047_v3  ;;  %v1092_v40 = vmax.f32 %v990_v50, 0.0  ;;  %v1102_v15 = vmax.f32 %v1030_v45, 0.0 }
 0x222   :  { %v1093_v52 = vmax.f32 %v993_v39, 0.0  ;;  %v1103_v59 = vmax.f32 %v1033_v14, 0.0  ;;  %v1349_v53 = vpop.f32.mrb[20].mxu1 }
 0x223   :  { %v1350_v42 = vpop.f32.mrb[21].mxu1 }
 0x224   :  { %v1120_v44 = vpack.c.bf16 %v1093_v52, %v1092_v40  ;;  %v1351_v2 = vadd.f32 %v1350_v42, %v1349_v53  ;;  %v1352_v25 = vpop.f32.mrb[22].mxu1  ;;  %v1125_v51 = vpack.c.bf16 %v1103_v59, %v1102_v15 }
 0x225   :  { %v1353_v27 = vpop.f32.mrb[23].mxu1 }
 0x226   :  { %v1038_v13 = vadd.f32 %v1351_v2, %v2051_v63  ;;  %v1354_v29 = vadd.f32 %v1353_v27, %v1352_v25  ;;  %1387 = vmatprep.subr.bf16.mxu0 %v1125_v51 }
 0x227   :  { %1388 = vmatpush3.bf16.msra.mxu0 %v2101_v7 }
 0x228   :  { %v1041_v61 = vadd.f32 %v1354_v29, %v2053_v48  ;;  %v1104_v3 = vmax.f32 %v1038_v13, 0.0 }
 0x22a   :  { %v1105_v54 = vmax.f32 %v1041_v61, 0.0  ;;  %v1355_v11 = vpop.f32.mrb[24].mxu1 }
 0x22b   :  { %v1356_v5 = vpop.f32.mrb[25].mxu1 }
 0x22c   :  { %v1357_v8 = vadd.f32 %v1356_v5, %v1355_v11  ;;  %v1358_v49 = vpop.f32.mrb[26].mxu1  ;;  %v1126_v37 = vpack.c.bf16 %v1105_v54, %v1104_v3 }
 0x22d   :  { %v1359_v47 = vpop.f32.mrb[27].mxu1 }
 0x22e   :  { %v1046_v16 = vadd.f32 %v1357_v8, %v2059_v17  ;;  %v1360_v56 = vadd.f32 %v1359_v47, %v1358_v49  ;;  %1389 = vmatprep.subr.bf16.mxu0 %v1126_v37 }
 0x22f   :  { %1390 = vmatpush3.bf16.msra.mxu0 %v2107_v62 }
 0x230   :  { %v1049_v63 = vadd.f32 %v1360_v56, %v2061_v57  ;;  %v1106_v28 = vmax.f32 %v1046_v16, 0.0 }
 0x232   :  { %v1107_v7 = vmax.f32 %v1049_v63, 0.0  ;;  %v1361_v20 = vpop.f32.mrb[28].mxu1 }
 0x233   :  { %v1362_v48 = vpop.f32.mrb[29].mxu1 }
 0x234   :  { %v1363_v41 = vadd.f32 %v1362_v48, %v1361_v20  ;;  %v1364_v43 = vpop.f32.mrb[30].mxu1  ;;  %v1127_v4 = vpack.c.bf16 %v1107_v7, %v1106_v28 }
 0x235   :  { %v1365_v34 = vpop.f32.mrb[31].mxu1 }
 0x236   :  { %v1054_v21 = vadd.f32 %v1363_v41, %v2074_v19  ;;  %v1366_v55 = vadd.f32 %v1365_v34, %v1364_v43  ;;  %1391 = vmatprep.subr.bf16.mxu0 %v1127_v4 }
 0x237   :  { %1392 = vmatpush3.bf16.msra.mxu0 %v1119_v9 }
 0x238   :  { %v1057_v17 = vadd.f32 %v1366_v55, %v2076_v6  ;;  %v1108_v10 = vmax.f32 %v1054_v21, 0.0 }
 0x23a   :  { %v1109_v36 = vmax.f32 %v1057_v17, 0.0  ;;  %v1367_v62 = vpop.f32.mrb[32].mxu1 }
 0x23b   :  { %v1368_v23 = vpop.f32.mrb[33].mxu1 }
 0x23c   :  { %v1369_v57 = vadd.f32 %v1368_v23, %v1367_v62  ;;  %v1370_v60 = vpop.f32.mrb[34].mxu1  ;;  %v1128_v46 = vpack.c.bf16 %v1109_v36, %v1108_v10 }
 0x23d   :  { %v1371_v0 = vpop.f32.mrb[35].mxu1 }
 0x23e   :  { %v1062_v24 = vadd.f32 %v1369_v57, %v2082_v30  ;;  %v1372_v50 = vadd.f32 %v1371_v0, %v1370_v60  ;;  %1393 = vmatprep.subr.bf16.mxu0 %v1128_v46 }
 0x23f   :  { %1394 = vmatpush3.bf16.msra.mxu0 %v1120_v44 }
 0x240   :  { %v1065_v19 = vadd.f32 %v1372_v50, %v2084_v22  ;;  %v1110_v45 = vmax.f32 %v1062_v24, 0.0 }
 0x242   :  { %v1111_v26 = vmax.f32 %v1065_v19, 0.0  ;;  %v1373_v9 = vpop.f32.mrb[36].mxu1 }
 0x243   :  { %v1374_v12 = vpop.f32.mrb[37].mxu1 }
 0x244   :  { %v1375_v6 = vadd.f32 %v1374_v12, %v1373_v9  ;;  %v1376_v39 = vpop.f32.mrb[38].mxu1  ;;  %v1129_v14 = vpack.c.bf16 %v1111_v26, %v1110_v45 }
 0x245   :  { %v1377_v40 = vpop.f32.mrb[39].mxu1 }
 0x246   :  { %v1070_v15 = vadd.f32 %v1375_v6, %v2086_v32  ;;  %v1378_v52 = vadd.f32 %v1377_v40, %v1376_v39  ;;  %1395 = vmatprep.subr.bf16.mxu0 %v1129_v14 }
 0x247   :  { %1396 = vmatpush3.bf16.msra.mxu0 %v2094_v58 }
 0x248   :  { %v1073_v30 = vadd.f32 %v1378_v52, %v2088_v31  ;;  %v1112_v59 = vmax.f32 %v1070_v15, 0.0  ;;  %v1253_v31 = vcombine.low %v2070_v35, %v2070_v35 }
 0x24a   :  { %v1113_v53 = vmax.f32 %v1073_v30, 0.0  ;;  %v1379_v42 = vpop.f32.mrb[40].mxu1 }
 0x24b   :  { %v1380_v22 = vpop.f32.mrb[41].mxu1 }
 0x24c   :  { %v1381_v44 = vadd.f32 %v1380_v22, %v1379_v42  ;;  %v1382_v2 = vpop.f32.mrb[42].mxu1  ;;  %v1130_v25 = vpack.c.bf16 %v1113_v53, %v1112_v59 }
 0x24d   :  { %v1383_v51 = vpop.f32.mrb[43].mxu1 }
 0x24e   :  { %v1078_v27 = vadd.f32 %v1381_v44, %v2090_v38  ;;  %v1384_v13 = vadd.f32 %v1383_v51, %v1382_v2  ;;  %1397 = vmatprep.subr.bf16.mxu0 %v1130_v25  ;;  %v1134_v38 = vstv %s2148_s5 }
 0x24f   :  { %1398 = vmatpush3.bf16.msra.mxu0 %v2099_v33 }
 0x250   :  { %v1081_v32 = vadd.f32 %v1384_v13, %v2092_v1  ;;  %v1114_v29 = vmax.f32 %v1078_v27, 0.0 }
 0x252   :  { %v1115_v58 = vmax.f32 %v1081_v32, 0.0 }
 0x254   :  { %v1131_v61 = vpack.c.bf16 %v1115_v58, %v1114_v29 }
 0x256   :  { %1399 = vmatprep.subr.bf16.mxu0 %v1131_v61 }
 0x257   :  { %1400 = vmatpush3.bf16.msra.mxu0 %v2105_v18 }
 0x25a   :  { %1175 = vmatmul.mubr.bf16.vlgmr.msra.gmra.mrb[52].mxu0 %v1253_v31 }
 0x32d   :  { %v1401_v3 = vpop.f32.mrb[52].mxu0 }
 0x32e   :  { %v1402_v54 = vpop.f32.mrb[53].mxu0 }
 0x32f   :  { %v1403_v11 = vadd.f32 %v1402_v54, %v1401_v3  ;;  %v1404_v33 = vpop.f32.mrb[54].mxu0 }
 0x330   :  { %v1405_v5 = vpop.f32.mrb[55].mxu0 }
 0x331   :  { %v1177_v1 = vadd.f32 %v1403_v11, %v1134_v38 }
 0x333   :  { %1182 = vst [vmem:[%s2149_s6] sm:$0xff] %v1177_v1 }

</bundles_post_ra>
